<compile_context>
chip_gen: v5e
topology: v5e:2x2
jax: 0.10.0
libtpu: 0.0.40
codegen_flags: <defaults>
</compile_context>

<pallas_src>
import functools

import jax
import jax.numpy as jnp
from jax import lax
from jax.experimental import pallas as pl
from jax.experimental.pallas import tpu as pltpu


# ---------------------------------------------------------------------------
# Pallas kernel: one (batch, query-tile) step of the non-local block.
#   xk_ref   : (C, N)    bf16 channels-first keys (read once per batch)
#   xres_ref : (C, TQ)   f32 query/residual tile (lane-dense)
#   wgp_ref  : (2Ci, C)  bf16 fused [g ; phi] conv(+BN) weights
#   bgp_ref  : (2Ci, 1)  f32 fused [g ; phi] biases
#   wt_ref   : (Ci, C)   bf16 theta conv(+BN) weight
#   bt_ref   : (Ci, 1)   f32 theta bias
#   ww_ref   : (C, Ci)   bf16 W conv(+BN) weight
#   bw_ref   : (C, 1)    f32 W bias
#   o_ref    : (C, TQ)   output tile (y + x), lane-dense
#   g_ref    : (Ci, N)   bf16 scratch — cached g projection (valid for current batch)
#   ph_ref   : (Ci, N)   bf16 scratch — cached phi projection
# ---------------------------------------------------------------------------
def _nonlocal_kernel(xk_ref, xres_ref, wgp_ref, bgp_ref, wt_ref, bt_ref,
                     ww_ref, bw_ref, o_ref, g_ref, ph_ref, *, ci):
    # ---- once per batch (first query tile): g / phi over the full key set ----
    @pl.when(pl.program_id(1) == 0)
    def _project_keys():
        # (2Ci, C)bf16 @ (C, N)bf16 -> (2Ci, N)f32 ; + bias ; ReLU ; cache as bf16.
        gp = jnp.dot(wgp_ref[...], xk_ref[...],
                     preferred_element_type=jnp.float32)
        gp = jnp.maximum(gp + bgp_ref[...], 0.0)
        g_ref[...] = gp[:ci].astype(jnp.bfloat16)
        ph_ref[...] = gp[ci:].astype(jnp.bfloat16)

    # ---- per query tile ----
    xq = xres_ref[...].astype(jnp.float32)                     # (C, TQ) residual, f32

    # theta projection, channels-first: (Ci, C)bf16 @ (C, TQ)bf16 -> (Ci, TQ)f32.
    th = jnp.dot(wt_ref[...], xq.astype(jnp.bfloat16),
                 preferred_element_type=jnp.float32) + bt_ref[...]
    th = jnp.maximum(th, 0.0)

    # scores f[q, k] = sum_c theta[c, q] * phi[c, k] -> (TQ, N), f32 accumulation.
    f = lax.dot_general(th.astype(jnp.bfloat16), ph_ref[...],
                        (((0,), (0,)), ((), ())),
                        preferred_element_type=jnp.float32)

    # Softmax over keys with DEFERRED normalization.
    p = jnp.exp(f - jnp.max(f, axis=-1, keepdims=True))        # (TQ, N) f32
    denom = jnp.sum(p, axis=-1, keepdims=True)                  # (TQ, 1) f32

    # attention apply: y[q, c] = sum_k p[q, k] * g[c, k] -> (TQ, Ci).
    y = lax.dot_general(p.astype(jnp.bfloat16), g_ref[...],
                        (((1,), (1,)), ((), ())),
                        preferred_element_type=jnp.float32)
    y = y * pl.reciprocal(denom, approx=True)                   # deferred softmax norm

    # W projection back to C channels: out[c, q] = sum_ci ww[c, ci] * y[q, ci].
    out = lax.dot_general(ww_ref[...], y.astype(jnp.bfloat16),
                          (((1,), (1,)), ((), ())),
                          preferred_element_type=jnp.float32)
    out = out + bw_ref[...] + xq                                # f32 bias + residual
    o_ref[...] = out.astype(o_ref.dtype)                        # lane-dense store


# ---------------------------------------------------------------------------
# Generation-aware sizing helpers
# ---------------------------------------------------------------------------
def _vmem_capacity_bytes():
    try:
        return int(pltpu.get_tpu_info().vmem_capacity_bytes)
    except Exception:
        return 64 * 1024 * 1024          # conservative (v7x-sized) fallback


def _vmem_estimate(C, Ci, N, tq):
    bf16, f32 = 2, 4
    return (
        2 * C * N * bf16                 # bf16 key block (pipeline reserves 2 buffers)
        + 2 * C * tq * f32               # f32 residual tile, double-buffered
        + 2 * C * tq * f32               # output tile, double-buffered
        + 2 * Ci * N * bf16              # g / phi bf16 scratch caches
        + 2 * Ci * N * f32               # transient f32 gp before the bf16 cast
        + tq * N * (f32 + bf16)          # score tile + transient bf16 copy
        + 2 * 1024 * 1024                # weights / biases / relayout headroom
    )


def _pick_tq(C, Ci, N):
    cap = _vmem_capacity_bytes()
    # TQ=256 fills the 256-wide MXU M dim on v6e/v7x; gate it on the VMEM budget
    # (important on v7x's 64 MiB).
    if N % 256 == 0 and N > 256 and _vmem_estimate(C, Ci, N, 256) < 0.6 * cap:
        return 256
    if N % 128 == 0 and N > 128:
        return 128
    # TODO(synk): flash-style key-axis tiling for large H*W not divisible by 128;
    # tq = N materializes an (N, N) score tile and collapses the q grid axis.
    return N


def _vmem_limit_bytes(C, Ci, N, tq):
    cap = int(0.85 * _vmem_capacity_bytes())   # leave compiler scratch headroom
    want = int(1.5 * _vmem_estimate(C, Ci, N, tq))
    return max(16 * 1024 * 1024, min(cap, want))


# ---------------------------------------------------------------------------
# Wrapper
# ---------------------------------------------------------------------------
def position_aware_attention(x_nchw, params, *, tq=None):
    """Forward pass of PositionAwareAttentionModule using the Pallas kernel."""
    B, C, H, W = x_nchw.shape
    N = H * W
    Ci = params["wg"].shape[0]

    x_cf = x_nchw.reshape(B, C, N)            # channels-first f32: residual / output
    x_keys = x_cf.astype(jnp.bfloat16)        # single wrapper cast; keys are only ever
                                              # bf16 MXU operands inside the kernel

    if tq is None:
        tq = _pick_tq(C, Ci, N)
    assert N % tq == 0, "query tile must divide H*W"
    nq = N // tq

    # Fused [g ; phi] projection; all matmul weights cast to bf16 once, biases f32.
    wgp = jnp.concatenate([params["wg"], params["wp"]], axis=0).astype(jnp.bfloat16)
    bgp = jnp.concatenate([params["bg"], params["bp"]], axis=0)
    wt = params["wt"].astype(jnp.bfloat16)
    ww = params["ww"].astype(jnp.bfloat16)

    kernel = functools.partial(_nonlocal_kernel, ci=Ci)

    # Projection FLOPs counted once per batch (hoisted), attention FLOPs over N^2.
    cost = pl.CostEstimate(
        flops=int(2 * B * Ci * N * (4 * C + 2 * N)),
        transcendentals=int(B * N * (N + 1)),
        bytes_accessed=int(B * C * N * (2 + 4 + 4) + 4096),
    )

    grid_spec = pltpu.PrefetchScalarGridSpec(
        num_scalar_prefetch=0,
        grid=(B, nq),
        in_specs=[
            # bf16 keys: full (C, N) block; its index only changes with b, so it is
            # DMA'd once per batch by the pipeline.
            pl.BlockSpec((pl.Squeezed(), C, N), lambda b, q: (b, 0, 0)),
            # f32 residual / theta-input query tile (lane-dense).
            pl.BlockSpec((pl.Squeezed(), C, tq), lambda b, q: (b, 0, q)),
            pl.BlockSpec((2 * Ci, C), lambda b, q: (0, 0)),   # fused g|phi weight (bf16)
            pl.BlockSpec((2 * Ci, 1), lambda b, q: (0, 0)),   # fused g|phi bias  (f32)
            pl.BlockSpec((Ci, C), lambda b, q: (0, 0)),       # theta weight      (bf16)
            pl.BlockSpec((Ci, 1), lambda b, q: (0, 0)),       # theta bias        (f32)
            pl.BlockSpec((C, Ci), lambda b, q: (0, 0)),       # W weight          (bf16)
            pl.BlockSpec((C, 1), lambda b, q: (0, 0)),        # W bias            (f32)
        ],
        out_specs=pl.BlockSpec((pl.Squeezed(), C, tq), lambda b, q: (b, 0, q)),
        scratch_shapes=[
            pltpu.VMEM((Ci, N), jnp.bfloat16),   # cached g projection (per batch)
            pltpu.VMEM((Ci, N), jnp.bfloat16),   # cached phi projection (per batch)
        ],
    )

    out = pl.pallas_call(
        kernel,
        out_shape=jax.ShapeDtypeStruct((B, C, N), x_nchw.dtype),
        grid_spec=grid_spec,
        compiler_params=pltpu.CompilerParams(
            # q must stay "arbitrary": g/phi scratch is initialized at q == 0 and
            # reused across the q sweep; megacore shards on the batch axis only.
            dimension_semantics=("parallel", "arbitrary"),
            vmem_limit_bytes=_vmem_limit_bytes(C, Ci, N, tq),
        ),
        cost_estimate=cost,
    )(x_keys, x_cf, wgp, bgp, wt, params["bt"], ww, params["bw"])

    return out.reshape(B, C, H, W)


# ---------------------------------------------------------------------------
# Deterministic parameter construction (synthetic; conv + eval-mode BN folded).
# Weights are stored channels-first: w (c_out, c_in), b (c_out, 1).
# ---------------------------------------------------------------------------
def _fold_conv_bn(key, c_in, c_out, eps=1e-5):
    k = jax.random.split(key, 6)
    w = jax.random.normal(k[0], (c_out, c_in), jnp.float32) * 0.2
    b = jax.random.normal(k[1], (c_out,), jnp.float32) * 0.1
    gamma = 1.0 + 0.1 * jax.random.normal(k[2], (c_out,), jnp.float32)
    beta = 0.1 * jax.random.normal(k[3], (c_out,), jnp.float32)
    r_mean = 0.1 * jax.random.normal(k[4], (c_out,), jnp.float32)
    r_var = 0.5 + jnp.abs(jax.random.normal(k[5], (c_out,), jnp.float32))
    s = gamma / jnp.sqrt(r_var + eps)
    w_eff = w * s[:, None]
    b_eff = (b - r_mean) * s + beta
    return w_eff, b_eff.reshape(c_out, 1)


def make_params(key, in_channels, inter_channels):
    kg, kt, kp, kw = jax.random.split(key, 4)
    wg, bg = _fold_conv_bn(kg, in_channels, inter_channels)
    wt, bt = _fold_conv_bn(kt, in_channels, inter_channels)
    wp, bp = _fold_conv_bn(kp, in_channels, inter_channels)
    ww, bw = _fold_conv_bn(kw, inter_channels, in_channels)
    return dict(wg=wg, bg=bg, wt=wt, bt=bt, wp=wp, bp=bp, ww=ww, bw=bw)


# ---------------------------------------------------------------------------
# Pure-JAX f32 reference (same math, no Pallas) for the correctness check
# ---------------------------------------------------------------------------
def reference(x_nchw, params):
    B, C, H, W = x_nchw.shape
    N = H * W
    x = x_nchw.reshape(B, C, N).astype(jnp.float32)

    def proj(w, b):
        return jnp.maximum(jnp.einsum("oc,bcn->bon", w, x) + b[None, :, :], 0.0)

    g = proj(params["wg"], params["bg"])     # (B, Ci, N)
    th = proj(params["wt"], params["bt"])    # (B, Ci, N)
    ph = proj(params["wp"], params["bp"])    # (B, Ci, N)
    f = jnp.einsum("bcq,bck->bqk", th, ph)   # (B, N, N)
    f = jax.nn.softmax(f, axis=-1)
    y = jnp.einsum("bck,bqk->bcq", g, f)     # (B, Ci, N)
    w_out = jnp.einsum("oc,bcn->bon", params["ww"], y) + params["bw"][None, :, :]
    z = w_out + x
    return z.reshape(B, C, H, W)


if __name__ == "__main__":
    key = jax.random.PRNGKey(0)
    kx, kp = jax.random.split(key)

    B, C, H, W = 2, 4, 16, 16                  # in_channels=4 -> inter_channels=2
    inter = max(C // 2, 1)

    x = jax.random.normal(kx, (B, C, H, W), jnp.float32)
    params = make_params(kp, C, inter)

    fwd = jax.jit(position_aware_attention)
    out = jax.block_until_ready(fwd(x, params))

    ref = reference(x, params)
    assert out.shape == (B, C, H, W)
    # bf16 MXU operands everywhere + approx EUP reciprocal in the softmax -> tolerance
    # looser than a pure-f32 comparison would need.
    assert jnp.allclose(out, ref, atol=5e-2, rtol=5e-2), (
        "Pallas output mismatch vs reference: max |diff| = "
        f"{float(jnp.max(jnp.abs(out - ref)))}")

    print("KERNEL_OK")
</pallas_src>

<mosaic_0001>
module attributes {stable_mosaic.version = 11 : i64} {
  func.func @_nonlocal_kernel(%arg0: i32, %arg1: i32, %arg2: memref<1x4x256xbf16, #tpu.memory_space<vmem>>, %arg3: memref<1x4x128xf32, #tpu.memory_space<vmem>>, %arg4: memref<4x4xbf16, #tpu.memory_space<vmem>>, %arg5: memref<4x1xf32, #tpu.memory_space<vmem>>, %arg6: memref<2x4xbf16, #tpu.memory_space<vmem>>, %arg7: memref<2x1xf32, #tpu.memory_space<vmem>>, %arg8: memref<4x2xbf16, #tpu.memory_space<vmem>>, %arg9: memref<4x1xf32, #tpu.memory_space<vmem>>, %arg10: memref<1x4x128xf32, #tpu.memory_space<vmem>>, %arg11: memref<2x256xbf16, #tpu.memory_space<vmem>>, %arg12: memref<2x256xbf16, #tpu.memory_space<vmem>>) attributes {dimension_semantics = [#tpu.dimension_semantics<parallel>, #tpu.dimension_semantics<arbitrary>], iteration_bounds = array<i64: 2, 2>, scalar_prefetch = 0 : i64, scratch_operands = 2 : i64, tpu.core_type = #tpu.core_type<tc>, window_params = [{transform_indices = @transform_0, window_bounds = array<i64: 1, 4, 256>}, {transform_indices = @transform_1, window_bounds = array<i64: 1, 4, 128>}, {pipeline_mode = #tpu.pipeline_mode<synchronous>, transform_indices = @transform_2, window_bounds = array<i64: 4, 4>}, {pipeline_mode = #tpu.pipeline_mode<synchronous>, transform_indices = @transform_3, window_bounds = array<i64: 4, 1>}, {pipeline_mode = #tpu.pipeline_mode<synchronous>, transform_indices = @transform_4, window_bounds = array<i64: 2, 4>}, {pipeline_mode = #tpu.pipeline_mode<synchronous>, transform_indices = @transform_5, window_bounds = array<i64: 2, 1>}, {pipeline_mode = #tpu.pipeline_mode<synchronous>, transform_indices = @transform_6, window_bounds = array<i64: 4, 2>}, {pipeline_mode = #tpu.pipeline_mode<synchronous>, transform_indices = @transform_7, window_bounds = array<i64: 4, 1>}, {transform_indices = @transform_8, window_bounds = array<i64: 1, 4, 128>}]} {
    %c0_i32 = arith.constant 0 : i32
    %0 = arith.cmpi eq, %arg1, %c0_i32 : i32
    %1 = arith.extui %0 : i1 to i32
    %c0_i32_0 = arith.constant 0 : i32
    %2 = arith.cmpi ne, %1, %c0_i32_0 : i32
    scf.if %2 {
      %c0_24 = arith.constant 0 : index
      %c0_25 = arith.constant 0 : index
      %39 = vector.load %arg4[%c0_24, %c0_25] : memref<4x4xbf16, #tpu.memory_space<vmem>>, vector<4x4xbf16>
      %c0_26 = arith.constant 0 : index
      %c0_27 = arith.constant 0 : index
      %c0_28 = arith.constant 0 : index
      %40 = vector.load %arg2[%c0_26, %c0_27, %c0_28] : memref<1x4x256xbf16, #tpu.memory_space<vmem>>, vector<1x4x256xbf16>
      %41 = vector.shape_cast %40 : vector<1x4x256xbf16> to vector<4x256xbf16>
      %cst_29 = arith.constant dense<0.000000e+00> : vector<4x256xf32>
      %42 = tpu.matmul %39, %41, %cst_29 {dimension_numbers = #tpu.dot_dimension_numbers<[1], [0], [0], [1], [0, 0, 1, 1], [], []>} : vector<4x4xbf16>, vector<4x256xbf16>, vector<4x256xf32> -> vector<4x256xf32>
      %c0_30 = arith.constant 0 : index
      %c0_31 = arith.constant 0 : index
      %43 = vector.load %arg5[%c0_30, %c0_31] : memref<4x1xf32, #tpu.memory_space<vmem>>, vector<4x1xf32>
      %44 = vector.broadcast %43 : vector<4x1xf32> to vector<4x256xf32>
      %45 = arith.addf %42, %44 : vector<4x256xf32>
      %cst_32 = arith.constant 0.000000e+00 : f32
      %46 = vector.broadcast %cst_32 : f32 to vector<4x256xf32>
      %47 = arith.maximumf %45, %46 : vector<4x256xf32>
      %48 = vector.extract_strided_slice %47 {offsets = [0, 0], sizes = [2, 256], strides = [1, 1]} : vector<4x256xf32> to vector<2x256xf32>
      %49 = arith.truncf %48 : vector<2x256xf32> to vector<2x256xbf16>
      %c0_33 = arith.constant 0 : index
      %c0_34 = arith.constant 0 : index
      %50 = vector.load %arg11[%c0_33, %c0_34] : memref<2x256xbf16, #tpu.memory_space<vmem>>, vector<2x256xbf16>
      tpu.vector_store %arg11[%c0_33, %c0_34], %49 {strides = array<i32>} : memref<2x256xbf16, #tpu.memory_space<vmem>>, vector<2x256xbf16>,
      %51 = vector.extract_strided_slice %47 {offsets = [2, 0], sizes = [2, 256], strides = [1, 1]} : vector<4x256xf32> to vector<2x256xf32>
      %52 = arith.truncf %51 : vector<2x256xf32> to vector<2x256xbf16>
      %c0_35 = arith.constant 0 : index
      %c0_36 = arith.constant 0 : index
      %53 = vector.load %arg12[%c0_35, %c0_36] : memref<2x256xbf16, #tpu.memory_space<vmem>>, vector<2x256xbf16>
      tpu.vector_store %arg12[%c0_35, %c0_36], %52 {strides = array<i32>} : memref<2x256xbf16, #tpu.memory_space<vmem>>, vector<2x256xbf16>,
    } else {
    }
    %c0 = arith.constant 0 : index
    %c0_1 = arith.constant 0 : index
    %c0_2 = arith.constant 0 : index
    %3 = vector.load %arg3[%c0, %c0_1, %c0_2] : memref<1x4x128xf32, #tpu.memory_space<vmem>>, vector<1x4x128xf32>
    %4 = vector.shape_cast %3 : vector<1x4x128xf32> to vector<4x128xf32>
    %c0_3 = arith.constant 0 : index
    %c0_4 = arith.constant 0 : index
    %5 = vector.load %arg6[%c0_3, %c0_4] : memref<2x4xbf16, #tpu.memory_space<vmem>>, vector<2x4xbf16>
    %6 = arith.truncf %4 : vector<4x128xf32> to vector<4x128xbf16>
    %cst = arith.constant dense<0.000000e+00> : vector<2x128xf32>
    %7 = tpu.matmul %5, %6, %cst {dimension_numbers = #tpu.dot_dimension_numbers<[1], [0], [0], [1], [0, 0, 1, 1], [], []>} : vector<2x4xbf16>, vector<4x128xbf16>, vector<2x128xf32> -> vector<2x128xf32>
    %c0_5 = arith.constant 0 : index
    %c0_6 = arith.constant 0 : index
    %8 = vector.load %arg7[%c0_5, %c0_6] : memref<2x1xf32, #tpu.memory_space<vmem>>, vector<2x1xf32>
    %9 = vector.broadcast %8 : vector<2x1xf32> to vector<2x128xf32>
    %10 = arith.addf %7, %9 : vector<2x128xf32>
    %cst_7 = arith.constant 0.000000e+00 : f32
    %11 = vector.broadcast %cst_7 : f32 to vector<2x128xf32>
    %12 = arith.maximumf %10, %11 : vector<2x128xf32>
    %13 = arith.truncf %12 : vector<2x128xf32> to vector<2x128xbf16>
    %c0_8 = arith.constant 0 : index
    %c0_9 = arith.constant 0 : index
    %14 = vector.load %arg12[%c0_8, %c0_9] : memref<2x256xbf16, #tpu.memory_space<vmem>>, vector<2x256xbf16>
    %cst_10 = arith.constant dense<0.000000e+00> : vector<128x256xf32>
    %15 = tpu.matmul %13, %14, %cst_10 {dimension_numbers = #tpu.dot_dimension_numbers<[0], [0], [1], [1], [0, 1, 1, 1], [], []>} : vector<2x128xbf16>, vector<2x256xbf16>, vector<128x256xf32> -> vector<128x256xf32>
    %cst_11 = arith.constant dense<0xFF800000> : vector<128xf32>
    %16 = vector.multi_reduction <maximumf>, %15, %cst_11 [1] : vector<128x256xf32> to vector<128xf32>
    %17 = vector.shape_cast %16 : vector<128xf32> to vector<128x1xf32>
    %18 = vector.broadcast %17 : vector<128x1xf32> to vector<128x256xf32>
    %19 = arith.subf %15, %18 : vector<128x256xf32>
    %20 = math.exp %19 : vector<128x256xf32>
    %cst_12 = arith.constant dense<0.000000e+00> : vector<128xf32>
    %21 = vector.multi_reduction <add>, %20, %cst_12 [1] : vector<128x256xf32> to vector<128xf32>
    %22 = vector.shape_cast %21 : vector<128xf32> to vector<128x1xf32>
    %23 = arith.truncf %20 : vector<128x256xf32> to vector<128x256xbf16>
    %c0_13 = arith.constant 0 : index
    %c0_14 = arith.constant 0 : index
    %24 = vector.load %arg11[%c0_13, %c0_14] : memref<2x256xbf16, #tpu.memory_space<vmem>>, vector<2x256xbf16>
    %cst_15 = arith.constant dense<0.000000e+00> : vector<128x2xf32>
    %25 = tpu.matmul %23, %24, %cst_15 {dimension_numbers = #tpu.dot_dimension_numbers<[1], [1], [0], [0], [0, 0, 1, 0], [], []>} : vector<128x256xbf16>, vector<2x256xbf16>, vector<128x2xf32> -> vector<128x2xf32>
    %26 = tpu.reciprocal %22 {approx = true} : vector<128x1xf32> -> vector<128x1xf32>
    %27 = vector.broadcast %26 : vector<128x1xf32> to vector<128x2xf32>
    %28 = arith.mulf %25, %27 : vector<128x2xf32>
    %c0_16 = arith.constant 0 : index
    %c0_17 = arith.constant 0 : index
    %29 = vector.load %arg8[%c0_16, %c0_17] : memref<4x2xbf16, #tpu.memory_space<vmem>>, vector<4x2xbf16>
    %30 = arith.truncf %28 : vector<128x2xf32> to vector<128x2xbf16>
    %cst_18 = arith.constant dense<0.000000e+00> : vector<4x128xf32>
    %31 = tpu.matmul %29, %30, %cst_18 {dimension_numbers = #tpu.dot_dimension_numbers<[1], [1], [0], [0], [0, 0, 1, 0], [], []>} : vector<4x2xbf16>, vector<128x2xbf16>, vector<4x128xf32> -> vector<4x128xf32>
    %c0_19 = arith.constant 0 : index
    %c0_20 = arith.constant 0 : index
    %32 = vector.load %arg9[%c0_19, %c0_20] : memref<4x1xf32, #tpu.memory_space<vmem>>, vector<4x1xf32>
    %33 = vector.broadcast %32 : vector<4x1xf32> to vector<4x128xf32>
    %34 = arith.addf %31, %33 : vector<4x128xf32>
    %35 = arith.addf %34, %4 : vector<4x128xf32>
    %c0_21 = arith.constant 0 : index
    %c0_22 = arith.constant 0 : index
    %c0_23 = arith.constant 0 : index
    %36 = vector.load %arg10[%c0_21, %c0_22, %c0_23] : memref<1x4x128xf32, #tpu.memory_space<vmem>>, vector<1x4x128xf32>
    %37 = vector.shape_cast %36 : vector<1x4x128xf32> to vector<4x128xf32>
    %38 = vector.shape_cast %35 : vector<4x128xf32> to vector<1x4x128xf32>
    tpu.vector_store %arg10[%c0_21, %c0_22, %c0_23], %38 {strides = array<i32>} : memref<1x4x128xf32, #tpu.memory_space<vmem>>, vector<1x4x128xf32>,
    return
  }
  func.func @transform_0(%arg0: i32, %arg1: i32) -> (i32, i32, i32) {
    %c0_i32 = arith.constant 0 : i32
    %c0_i32_0 = arith.constant 0 : i32
    %c0_i32_1 = arith.constant 0 : i32
    return %arg0, %c0_i32, %c0_i32_0 : i32, i32, i32
  }
  func.func @transform_1(%arg0: i32, %arg1: i32) -> (i32, i32, i32) {
    %c0_i32 = arith.constant 0 : i32
    %c0_i32_0 = arith.constant 0 : i32
    return %arg0, %c0_i32, %arg1 : i32, i32, i32
  }
  func.func @transform_2(%arg0: i32, %arg1: i32) -> (i32, i32) {
    %c0_i32 = arith.constant 0 : i32
    %c0_i32_0 = arith.constant 0 : i32
    %c0_i32_1 = arith.constant 0 : i32
    return %c0_i32, %c0_i32_0 : i32, i32
  }
  func.func @transform_3(%arg0: i32, %arg1: i32) -> (i32, i32) {
    %c0_i32 = arith.constant 0 : i32
    %c0_i32_0 = arith.constant 0 : i32
    %c0_i32_1 = arith.constant 0 : i32
    return %c0_i32, %c0_i32_0 : i32, i32
  }
  func.func @transform_4(%arg0: i32, %arg1: i32) -> (i32, i32) {
    %c0_i32 = arith.constant 0 : i32
    %c0_i32_0 = arith.constant 0 : i32
    %c0_i32_1 = arith.constant 0 : i32
    return %c0_i32, %c0_i32_0 : i32, i32
  }
  func.func @transform_5(%arg0: i32, %arg1: i32) -> (i32, i32) {
    %c0_i32 = arith.constant 0 : i32
    %c0_i32_0 = arith.constant 0 : i32
    %c0_i32_1 = arith.constant 0 : i32
    return %c0_i32, %c0_i32_0 : i32, i32
  }
  func.func @transform_6(%arg0: i32, %arg1: i32) -> (i32, i32) {
    %c0_i32 = arith.constant 0 : i32
    %c0_i32_0 = arith.constant 0 : i32
    %c0_i32_1 = arith.constant 0 : i32
    return %c0_i32, %c0_i32_0 : i32, i32
  }
  func.func @transform_7(%arg0: i32, %arg1: i32) -> (i32, i32) {
    %c0_i32 = arith.constant 0 : i32
    %c0_i32_0 = arith.constant 0 : i32
    %c0_i32_1 = arith.constant 0 : i32
    return %c0_i32, %c0_i32_0 : i32, i32
  }
  func.func @transform_8(%arg0: i32, %arg1: i32) -> (i32, i32, i32) {
    %c0_i32 = arith.constant 0 : i32
    %c0_i32_0 = arith.constant 0 : i32
    return %arg0, %c0_i32, %arg1 : i32, i32, i32
  }
}

</mosaic_0001>

<bundles_post_ra>
// kernel: position_aware_attention.1
= control target key start
LH: loop header
LB: loop body
LE: loop exit
PB: predicated region body
PF: predicated region fallthrough
CT: control target
= control target key end

     0   :  { %s1369_s27 = smov 0   ;;  %s1371_s28 = smov 0   ;;  %s1659_s0 = inlined_call_operand.vmem [shape: bf16[2,4,256], index: 0, kind: input, shape index: {}]   ;;  %s1660_s1 = inlined_call_operand.vmem [shape: f32[2,4,256], index: 1, kind: input, shape index: {}]   ;;  %s1661_s2 = inlined_call_operand.vmem [shape: bf16[4,4], index: 2, kind: input, shape index: {}]   ;;  %s1662_s3 = inlined_call_operand.vmem [shape: f32[4,1], index: 3, kind: input, shape index: {}]   ;;  %s1663_s4 = inlined_call_operand.vmem [shape: bf16[2,4], index: 4, kind: input, shape index: {}]   ;;  %s1664_s5 = inlined_call_operand.vmem [shape: f32[2,1], index: 5, kind: input, shape index: {}]   ;;  %s1665_s6 = inlined_call_operand.vmem [shape: bf16[4,2], index: 6, kind: input, shape index: {}]   ;;  %s1666_s7 = inlined_call_operand.vmem [shape: f32[4,1], index: 7, kind: input, shape index: {}]   ;;  %s1667_s8 = inlined_call_operand.vmem [shape: f32[2,4,256], index: 8, kind: output, shape index: {}]  }
   0x1   :  { %s1373_s29 = smov 0   ;;  %s1375_s30 = smov 0  }
   0x2   :  { %s1377_s9 = smov 0  }
   0x3 LB: > { %s27_s10 = sadd.s32 1, %s1312_s29  ;;  %s30_s11 = sadd.s32 1, %s1316_s30  ;;  %s1320_s9 = sphi %s1377_s9, %s18_s9   ;;  %s1316_s30 = sphi %s1375_s30, %s1671_s30   ;;  %s1312_s29 = sphi %s1373_s29, %s1670_s29   ;;  %s1308_s28 = sphi %s1371_s28, %s1669_s28   ;;  %s1304_s27 = sphi %s1369_s27, %s1668_s27  }
   0x4   : > { %p28_p0 = scmp.ge.s32.totalorder %s27_s10, 2  ;;  %p1110_p1 = scmp.ge.s32.totalorder %s1320_s9, 1 }
   0x5   : > { %p291_p2 = scmp.lt.s32.totalorder %s1320_s9, 5 }
   0x6   : > { %s1673_s10 = smov (%p28_p0, %s27_s10), 0  ;;  %s1675_s11 = smov (!%p28_p0, %s30_s11), %s1316_s30 }
   0x7   : > { %p292_p3 = pnand %p1110_p1, %p291_p2  ;;  %p32_p4 = scmp.ge.s32.totalorder %s1675_s11, 2 }
   0x8   : > { %p336_p5 = scmp.lt.s32.totalorder (!%p292_p3), %s1308_s28, 1  ;;  %p343_p6 = scmp.lt.s32.totalorder (!%p292_p3), %s1304_s27, 1 }
   0x9   : > { %s1677_s11 = smov (%p32_p4, %s1675_s11), 0  ;;  %295 = sbr.rel (%p292_p3) target bundleno = 1216 (0x4c0), region = 52 }
   0xa   : > { %p1117_p7 = scmp.ne.s32.totalorder (!%p292_p3), %s1304_s27, 0 }
   0xe   : > { %s1679_s28 = smov (!%p336_p5, %s1308_s28), 1 }
   0xf   : > { %s344_s12 = scalar_select %p343_p6, %s1304_s27, 1 }
  0x10   : > { %s1140_s13 = sshll.u32 %s1679_s28, 2  ;;  %s1113_s14 = sshll.u32 %s1679_s28, 1 }
  0x11   : > { %s340_s17 = scalar_lea.vmem %s1659_s0, %s1140_s13  ;;  %s346_s18 = sadd.s32 %s1113_s14, %s344_s12 }
  0x12   : > { %s1114_s19 = sshll.u32 %s346_s18, 2  ;;  %361 = sbr.rel (%p1117_p7) target bundleno = 177 (0xb1), region = 56 }
  0x13   : > { %s1405_s22 = scalar_lea.vmem %s1660_s1, %s1114_s19  ;;  %s1410_s25 = scalar_lea.vmem %s1667_s8, %s1114_s19 }
  0x17   : > { %v363_v0 = vld [vmem:[%s340_s17] sm:$0xf]  ;;  %v1322_v2 = vmov 0   ;;  %vm378_vm0 = vcmask 1041408   ;;  %vm374_vm1 = vcmask 31744   ;;  %vm414_vm2 = vcmask 1040384  }
  0x18   : > { %371 = vst [vmem:[#allocation1] ss:$4 sm:$0xff] %v363_v0  ;;  %v364_v1 = vld [vmem:[%s1662_s3] sm:$0xf]  ;;  %1183 = vset.pattern.permute.xlu0 %v1322_v2 }
  0x19   : > { %367 = vperm.xlu0 %1183, %v364_v1   ;;  %v362_v7 = vld [vmem:[%s1661_s2] sm:$0x3] }
  0x1f   : > { %v372_v3 = vld.sshfl [vmem:[#allocation1] sm:$0xff pattern:$0x73625140]  ;;  %v373_v4 = vld.sshfl [vmem:[#allocation1 + $0x8] sm:$0xff pattern:$0x73625140] }
  0x20   : > { %v379_v5 = vsel %vm378_vm0, %v372_v3, 0  ;;  %v381_v6 = vsel %vm378_vm0, %v373_v4, 0 }
  0x21   : > { %390 = vmatpush.bf16.msra.mxu0 %v379_v5  ;;  %403 = vmatpush.bf16.msra.mxu1 %v381_v6 }
  0x24   : > { %1118 = vmatmul.msk.bf16.vlgmr.msra.gmra.mxu0 %vm374_vm1, %v362_v7  ;;  %1119 = vmatmul.msk.bf16.vlgmr.msra.gmra.mxu1 %vm374_vm1, %v362_v7 }
  0x8b   : > { %v368_v8 = vpop.permute.xlu0 %367 }
  0xa1   : > { %v392_v9 = vpop.f32.mrf.mxu0  ;;  %v405_v10 = vpop.f32.mrf.mxu1 }
  0xa2   : > { %v393_v11 = vadd.f32 %v392_v9, %v368_v8  ;;  %v406_v12 = vadd.f32 %v405_v10, %v368_v8 }
  0xa4   : > { %v409_v13 = vmax.f32 %v393_v11, 0.0  ;;  %v410_v14 = vmax.f32 %v406_v12, 0.0 }
  0xa6   : > { %v411_v15 = vpack.c.bf16 %v410_v14, %v409_v13 }
  0xa8   : > { %v413_v16 = vrot.slane %v411_v15, 3  ;;  %420 = vst [vmem:[#allocation1] sm:$0xff] %v411_v15 }
  0xa9   : > { %v394_v17 = vpop.f32.mrf.mxu0  ;;  %v407_v18 = vpop.f32.mrf.mxu1 }
  0xaa   : > { %v417_v19 = vsel %vm414_vm2, %v411_v15, %v413_v16 }
  0xab   : > { %419 = vst [vmem:[#allocation2] sm:$0x3] %v417_v19 }
  0xaf   : > { %v422_v20 = vld [vmem:[#allocation1 + $0x1] ss:$4 sm:$0xff] }
  0xb0   : > { %424 = vst [vmem:[#allocation3] sm:$0x3] %v422_v20 }
  0xb1 PF: > { %v1419_v21 = vld [vmem:[%s1405_s22] sm:$0xf]  ;;  %vm438_vm3 = vcmask 1041408   ;;  %v1323_v24 = vmov 0   ;;  %vm434_vm4 = vcmask 31744   ;;  %vm503_vm5 = vcmask 1040384  }
  0xb2   : > { %v427_v22 = vpack.c.bf16 %v1419_v21, %v1419_v21  ;;  %v428_v23 = vld [vmem:[%s1664_s5] sm:$0x3]  ;;  %1184 = vset.pattern.permute.xlu0 %v1323_v24  ;;  %1185 = vset.pattern.permute.xlu2 %v1323_v24  ;;  %v814_v28 = vld [vmem:[#allocation2] sm:$0x3]  ;;  %vm478_vm6 = vcmask 15360  }
  0xb3   : > { %431 = vperm.xlu0 %1184, %v428_v23   ;;  %v426_v26 = vld [vmem:[%s1663_s4] sm:$0x1] }
  0xb4   : > { %v440_v25 = vsel %vm438_vm3, %v427_v22, 0 }
  0xb5   : > { %449 = vmatpush.bf16.msra.mxu0 %v440_v25 }
  0xb7   : > { %v457_v27 = vld [vmem:[#allocation3] sm:$0x3] }
  0xb8   : > { %1120 = vmatmul.msk.bf16.vlgmr.msra.gmra.mxu0 %vm434_vm4, %v426_v26  ;;  %475 = vst [vmem:[#allocation1] ss:$9 sm:$0xff] %v457_v27 }
  0xbf   : > { %v476_v29 = vld [vmem:[#allocation1] sm:$0xff]  ;;  %v477_v30 = vld [vmem:[#allocation1 + $0x9] sm:$0xff] }
  0xc0   : > { %v504_v31 = vsel %vm503_vm5, %v476_v29, 0  ;;  %v506_v32 = vsel %vm503_vm5, %v477_v30, 0  ;;  %816 = vst [vmem:[#allocation1] ss:$9 sm:$0xff] %v814_v28 }
  0xc1   : > { %515 = vmatpush.bf16.msra.mxu1 %v504_v31  ;;  %564 = vmatpush.bf16.msra.mxu2 %v506_v32 }
  0xc7   : > { %v817_v24 = vld [vmem:[#allocation1] sm:$0xff]  ;;  %v818_v25 = vld [vmem:[#allocation1 + $0x9] sm:$0xff] }
  0xc8   : > { %828 = vmatpush.bf16.xpose.msra.mxu3 %v817_v24  ;;  %877 = vmatpush.bf16.xpose.msrb.mxu0 %v818_v25 }
 0x125   : > { %v432_v33 = vpop.permute.xlu0 %431 }
 0x135   : > { %v451_v34 = vpop.f32.mrf.mxu0 }
 0x136   : > { %v452_v35 = vadd.f32 %v451_v34, %v432_v33 }
 0x138   : > { %v455_v36 = vmax.f32 %v452_v35, 0.0 }
 0x13a   : > { %v456_v37 = vpack.c.bf16 %v455_v36, %v455_v36 }
 0x13c   : > { %458 = vxpose.xlu0.c.b16.start.end [1/1] (short) %v456_v37, 128 }
 0x13d   : > { %v453_v38 = vpop.f32.mrf.mxu0 }
 0x1e8   : > { %v466_v39 = vpop.trf.xlu0 }
 0x1e9   : > { %1121 = vmatmul.msk.bf16.vlgmr.msra.gmra.mxu1 %vm478_vm6, %v466_v39  ;;  %1129 = vmatmul.msk.bf16.vlgmr.msra.gmra.mxu2 %vm478_vm6, %v466_v39 }
 0x1f8   : > { %v467_v40 = vpop.trf.xlu0 }
 0x1f9   : > { %1122 = vmatmul.msk.bf16.gmra.mxu1 %vm478_vm6, %v467_v40  ;;  %1130 = vmatmul.msk.bf16.gmra.mxu2 %vm478_vm6, %v467_v40 }
 0x208   : > { %v468_v41 = vpop.trf.xlu0 }
 0x209   : > { %1123 = vmatmul.msk.bf16.gmra.mxu1 %vm478_vm6, %v468_v41  ;;  %1131 = vmatmul.msk.bf16.gmra.mxu2 %vm478_vm6, %v468_v41 }
 0x218   : > { %v469_v42 = vpop.trf.xlu0 }
 0x219   : > { %1124 = vmatmul.msk.bf16.gmra.mxu1 %vm478_vm6, %v469_v42  ;;  %1132 = vmatmul.msk.bf16.gmra.mxu2 %vm478_vm6, %v469_v42 }
 0x228   : > { %v470_v43 = vpop.trf.xlu0 }
 0x229   : > { %1125 = vmatmul.msk.bf16.gmra.mxu1 %vm478_vm6, %v470_v43  ;;  %1133 = vmatmul.msk.bf16.gmra.mxu2 %vm478_vm6, %v470_v43 }
 0x238   : > { %v471_v44 = vpop.trf.xlu0 }
 0x239   : > { %1126 = vmatmul.msk.bf16.gmra.mxu1 %vm478_vm6, %v471_v44  ;;  %1134 = vmatmul.msk.bf16.gmra.mxu2 %vm478_vm6, %v471_v44 }
 0x248   : > { %v472_v45 = vpop.trf.xlu0 }
 0x249   : > { %1127 = vmatmul.msk.bf16.gmra.mxu1 %vm478_vm6, %v472_v45  ;;  %1135 = vmatmul.msk.bf16.gmra.mxu2 %vm478_vm6, %v472_v45 }
 0x258   : > { %v473_v46 = vpop.trf.xlu0 }
 0x259   : > { %1128 = vmatmul.msk.bf16.gmra.mxu1 %vm478_vm6, %v473_v46  ;;  %1136 = vmatmul.msk.bf16.gmra.mxu2 %vm478_vm6, %v473_v46 }
 0x266   : > { %v1445_v47 = vpop.f32.mrf.mxu1 }
 0x26c   : > { %v1447_v48 = vpop.f32.mrf.mxu2 }
 0x26d   : > { %v606_v49 = vmax.f32 %v1445_v47, %v1447_v48 }
 0x26e   : > { %v1451_v50 = vpop.f32.mrf.mxu1 }
 0x26f   : > { %607 = vmax.xlane.f32.xlu1 %v606_v49 }
 0x274   : > { %v1453_v51 = vpop.f32.mrf.mxu2 }
 0x275   : > { %v609_v52 = vmax.f32 %v1451_v50, %v1453_v51 }
 0x276   : > { %v1457_v53 = vpop.f32.mrf.mxu1 }
 0x277   : > { %610 = vmax.xlane.f32.xlu1 %v609_v52 }
 0x27c   : > { %v1459_v54 = vpop.f32.mrf.mxu2 }
 0x27d   : > { %v612_v55 = vmax.f32 %v1457_v53, %v1459_v54 }
 0x27e   : > { %v1463_v56 = vpop.f32.mrf.mxu1 }
 0x27f   : > { %613 = vmax.xlane.f32.xlu2 %v612_v55 }
 0x284   : > { %v1465_v57 = vpop.f32.mrf.mxu2 }
 0x285   : > { %v615_v58 = vmax.f32 %v1463_v56, %v1465_v57 }
 0x286   : > { %v1469_v59 = vpop.f32.mrf.mxu1 }
 0x287   : > { %616 = vmax.xlane.f32.xlu2 %v615_v58 }
 0x28c   : > { %v1471_v60 = vpop.f32.mrf.mxu2 }
 0x28d   : > { %v618_v61 = vmax.f32 %v1469_v59, %v1471_v60 }
 0x28e   : > { %v1475_v62 = vpop.f32.mrf.mxu1 }
 0x28f   : > { %619 = vmax.xlane.f32.xlu1 %v618_v61 }
 0x294   : > { %v1477_v63 = vpop.f32.mrf.mxu2 }
 0x295   : > { %v621_v0 = vmax.f32 %v1475_v62, %v1477_v63 }
 0x296   : > { %v1481_v1 = vpop.f32.mrf.mxu1 }
 0x297   : > { %622 = vmax.xlane.f32.xlu2 %v621_v0 }
 0x29c   : > { %v1483_v2 = vpop.f32.mrf.mxu2 }
 0x29d   : > { %v624_v3 = vmax.f32 %v1481_v1, %v1483_v2 }
 0x29e   : > { %v1487_v4 = vpop.f32.mrf.mxu1 }
 0x29f   : > { %625 = vmax.xlane.f32.xlu1 %v624_v3 }
 0x2a4   : > { %v1489_v5 = vpop.f32.mrf.mxu2 }
 0x2a5   : > { %v627_v6 = vmax.f32 %v1487_v4, %v1489_v5 }
 0x2a6   : > { %v1493_v7 = vpop.f32.mrf.mxu1 }
 0x2a7   : > { %628 = vmax.xlane.f32.xlu2 %v627_v6 }
 0x2ac   : > { %v1495_v8 = vpop.f32.mrf.mxu2 }
 0x2ad   : > { %v630_v9 = vmax.f32 %v1493_v7, %v1495_v8 }
 0x2ae   : > { %v1499_v10 = vpop.f32.mrf.mxu1 }
 0x2af   : > { %631 = vmax.xlane.f32.xlu1 %v630_v9 }
 0x2b4   : > { %v1501_v11 = vpop.f32.mrf.mxu2 }
 0x2b5   : > { %v633_v12 = vmax.f32 %v1499_v10, %v1501_v11 }
 0x2b6   : > { %v1505_v13 = vpop.f32.mrf.mxu1 }
 0x2b7   : > { %634 = vmax.xlane.f32.xlu2 %v633_v12 }
 0x2bc   : > { %v1507_v14 = vpop.f32.mrf.mxu2 }
 0x2bd   : > { %v636_v15 = vmax.f32 %v1505_v13, %v1507_v14 }
 0x2be   : > { %v1511_v16 = vpop.f32.mrf.mxu1 }
 0x2bf   : > { %637 = vmax.xlane.f32.xlu1 %v636_v15 }
 0x2c4   : > { %v1513_v17 = vpop.f32.mrf.mxu2 }
 0x2c5   : > { %v639_v18 = vmax.f32 %v1511_v16, %v1513_v17 }
 0x2c6   : > { %v1517_v19 = vpop.f32.mrf.mxu1 }
 0x2c7   : > { %640 = vmax.xlane.f32.xlu2 %v639_v18 }
 0x2cc   : > { %v1519_v20 = vpop.f32.mrf.mxu2 }
 0x2cd   : > { %v642_v22 = vmax.f32 %v1517_v19, %v1519_v20 }
 0x2ce   : > { %v1523_v23 = vpop.f32.mrf.mxu1 }
 0x2cf   : > { %643 = vmax.xlane.f32.xlu0 %v642_v22 }
 0x2d4   : > { %v1525_v26 = vpop.f32.mrf.mxu2 }
 0x2d5   : > { %v645_v27 = vmax.f32 %v1523_v23, %v1525_v26 }
 0x2d6   : > { %v1529_v28 = vpop.f32.mrf.mxu1 }
 0x2d7   : > { %646 = vmax.xlane.f32.xlu1 %v645_v27 }
 0x2dc   : > { %v1531_v29 = vpop.f32.mrf.mxu2 }
 0x2dd   : > { %v648_v30 = vmax.f32 %v1529_v28, %v1531_v29 }
 0x2de   : > { %v1537_v34 = vpop.f32.mrf.mxu1 }
 0x2df   : > { %649 = vmax.xlane.f32.xlu2 %v648_v30 }
 0x2e2   : > { %v608_v31 = vpop.xlane.xlu1 %607 }
 0x2e3   : > { %v654_v32 = vsub.f32 %v1445_v47, %v608_v31  ;;  %v655_v33 = vsub.f32 %v1447_v48, %v608_v31 }
 0x2e4   : > { %v1539_v35 = vpop.f32.mrf.mxu2 }
 0x2e5   : > { %v686_v36 = vmul.f32 1.442695, %v654_v32  ;;  %v688_v37 = vmul.f32 1.442695, %v655_v33  ;;  %v651_v38 = vmax.f32 %v1537_v34, %v1539_v35 }
 0x2e7   : > { %1186 = vpow2.f32 %v686_v36  ;;  %652 = vmax.xlane.f32.xlu1 %v651_v38 }
 0x2e8   : > { %1188 = vpow2.f32 %v688_v37 }
 0x2ea   : > { %v611_v39 = vpop.xlane.xlu1 %610 }
 0x2eb   : > { %v656_v40 = vsub.f32 %v1451_v50, %v611_v39  ;;  %v657_v41 = vsub.f32 %v1453_v51, %v611_v39 }
 0x2ed   : > { %v1187_v42 = vpop.eup %1186  ;;  %v690_v43 = vmul.f32 1.442695, %v656_v40  ;;  %v692_v44 = vmul.f32 1.442695, %v657_v41 }
 0x2ee   : > { %v1189_v45 = vpop.eup %1188 }
 0x2ef   : > { %1190 = vpow2.f32 %v690_v43  ;;  %v1545_v46 = vadd.f32 %v1189_v45, %v1187_v42 }
 0x2f0   : > { %1192 = vpow2.f32 %v692_v44 }
 0x2f2   : > { %v614_v47 = vpop.xlane.xlu2 %613 }
 0x2f3   : > { %v658_v48 = vsub.f32 %v1457_v53, %v614_v47  ;;  %v659_v49 = vsub.f32 %v1459_v54, %v614_v47 }
 0x2f5   : > { %v1191_v52 = vpop.eup %1190  ;;  %v694_v55 = vmul.f32 1.442695, %v658_v48  ;;  %v696_v58 = vmul.f32 1.442695, %v659_v49 }
 0x2f6   : > { %v1193_v61 = vpop.eup %1192  ;;  %v798_v50 = vpack.c.bf16 %v1191_v52, %v1187_v42 }
 0x2f7   : > { %1194 = vpow2.f32 %v694_v55  ;;  %v799_v51 = vpack.c.bf16 %v1193_v61, %v1189_v45  ;;  %v1549_v0 = vadd.f32 %v1193_v61, %v1191_v52 }
 0x2f8   : > { %1196 = vpow2.f32 %v696_v58  ;;  %829 = vmatmul.bf16.vlgmr.msra.gmra.mxu3 %v798_v50 }
 0x2f9   : > { %878 = vmatmul.bf16.vlgmr.msrb.gmra.mxu0 %v799_v51 }
 0x2fa   : > { %v617_v3 = vpop.xlane.xlu2 %616 }
 0x2fb   : > { %v660_v6 = vsub.f32 %v1463_v56, %v617_v3  ;;  %v661_v9 = vsub.f32 %v1465_v57, %v617_v3 }
 0x2fd   : > { %v1195_v53 = vpop.eup %1194  ;;  %v698_v12 = vmul.f32 1.442695, %v660_v6  ;;  %v700_v54 = vmul.f32 1.442695, %v661_v9 }
 0x2fe   : > { %v1197_v15 = vpop.eup %1196 }
 0x2ff   : > { %1198 = vpow2.f32 %v698_v12  ;;  %v1553_v18 = vadd.f32 %v1197_v15, %v1195_v53 }
 0x300   : > { %1200 = vpow2.f32 %v700_v54 }
 0x302   : > { %v620_v22 = vpop.xlane.xlu1 %619 }
 0x303   : > { %v662_v24 = vsub.f32 %v1469_v59, %v620_v22  ;;  %v663_v25 = vsub.f32 %v1471_v60, %v620_v22 }
 0x305   : > { %v1199_v27 = vpop.eup %1198  ;;  %v702_v30 = vmul.f32 1.442695, %v662_v24  ;;  %v704_v31 = vmul.f32 1.442695, %v663_v25 }
 0x306   : > { %v1201_v32 = vpop.eup %1200  ;;  %v800_v56 = vpack.c.bf16 %v1199_v27, %v1195_v53 }
 0x307   : > { %1202 = vpow2.f32 %v702_v30  ;;  %v801_v57 = vpack.c.bf16 %v1201_v32, %v1197_v15  ;;  %v1557_v33 = vadd.f32 %v1201_v32, %v1199_v27 }
 0x308   : > { %1204 = vpow2.f32 %v704_v31  ;;  %834 = vmatmul.bf16.gmra.mxu3 %v800_v56 }
 0x309   : > { %883 = vmatmul.bf16.gmra.mxu0 %v801_v57 }
 0x30a   : > { %v623_v36 = vpop.xlane.xlu2 %622 }
 0x30b   : > { %v664_v37 = vsub.f32 %v1475_v62, %v623_v36  ;;  %v665_v38 = vsub.f32 %v1477_v63, %v623_v36 }
 0x30d   : > { %v1203_v59 = vpop.eup %1202  ;;  %v706_v39 = vmul.f32 1.442695, %v664_v37  ;;  %v708_v60 = vmul.f32 1.442695, %v665_v38 }
 0x30e   : > { %v1205_v40 = vpop.eup %1204 }
 0x30f   : > { %1206 = vpow2.f32 %v706_v39  ;;  %v1561_v41 = vadd.f32 %v1205_v40, %v1203_v59 }
 0x310   : > { %1208 = vpow2.f32 %v708_v60 }
 0x312   : > { %v626_v42 = vpop.xlane.xlu1 %625 }
 0x313   : > { %v666_v43 = vsub.f32 %v1481_v1, %v626_v42  ;;  %v667_v44 = vsub.f32 %v1483_v2, %v626_v42 }
 0x315   : > { %v1207_v45 = vpop.eup %1206  ;;  %v710_v47 = vmul.f32 1.442695, %v666_v43  ;;  %v712_v48 = vmul.f32 1.442695, %v667_v44 }
 0x316   : > { %v1209_v49 = vpop.eup %1208  ;;  %v802_v62 = vpack.c.bf16 %v1207_v45, %v1203_v59 }
 0x317   : > { %1210 = vpow2.f32 %v710_v47  ;;  %v803_v63 = vpack.c.bf16 %v1209_v49, %v1205_v40  ;;  %v1565_v52 = vadd.f32 %v1209_v49, %v1207_v45 }
 0x318   : > { %1212 = vpow2.f32 %v712_v48  ;;  %839 = vmatmul.bf16.gmra.mxu3 %v802_v62 }
 0x319   : > { %888 = vmatmul.bf16.gmra.mxu0 %v803_v63 }
 0x31a   : > { %v629_v55 = vpop.xlane.xlu2 %628 }
 0x31b   : > { %v668_v58 = vsub.f32 %v1487_v4, %v629_v55  ;;  %v669_v61 = vsub.f32 %v1489_v5, %v629_v55 }
 0x31d   : > { %v1211_v1 = vpop.eup %1210  ;;  %v714_v50 = vmul.f32 1.442695, %v668_v58  ;;  %v716_v2 = vmul.f32 1.442695, %v669_v61 }
 0x31e   : > { %v1213_v51 = vpop.eup %1212 }
 0x31f   : > { %1214 = vpow2.f32 %v714_v50  ;;  %v1569_v3 = vadd.f32 %v1213_v51, %v1211_v1 }
 0x320   : > { %1216 = vpow2.f32 %v716_v2 }
 0x322   : > { %v632_v6 = vpop.xlane.xlu1 %631 }
 0x323   : > { %v670_v9 = vsub.f32 %v1493_v7, %v632_v6  ;;  %v671_v53 = vsub.f32 %v1495_v8, %v632_v6 }
 0x325   : > { %v1215_v12 = vpop.eup %1214  ;;  %v718_v54 = vmul.f32 1.442695, %v670_v9  ;;  %v720_v15 = vmul.f32 1.442695, %v671_v53 }
 0x326   : > { %v1217_v22 = vpop.eup %1216  ;;  %v804_v4 = vpack.c.bf16 %v1215_v12, %v1211_v1 }
 0x327   : > { %1218 = vpow2.f32 %v718_v54  ;;  %v805_v5 = vpack.c.bf16 %v1217_v22, %v1213_v51  ;;  %v1573_v24 = vadd.f32 %v1217_v22, %v1215_v12 }
 0x328   : > { %1220 = vpow2.f32 %v720_v15  ;;  %844 = vmatmul.bf16.gmra.mxu3 %v804_v4 }
 0x329   : > { %893 = vmatmul.bf16.gmra.mxu0 %v805_v5 }
 0x32a   : > { %v635_v25 = vpop.xlane.xlu2 %634 }
 0x32b   : > { %v672_v27 = vsub.f32 %v1499_v10, %v635_v25  ;;  %v673_v30 = vsub.f32 %v1501_v11, %v635_v25 }
 0x32d   : > { %v1219_v7 = vpop.eup %1218  ;;  %v722_v31 = vmul.f32 1.442695, %v672_v27  ;;  %v724_v8 = vmul.f32 1.442695, %v673_v30 }
 0x32e   : > { %v1221_v32 = vpop.eup %1220 }
 0x32f   : > { %1222 = vpow2.f32 %v722_v31  ;;  %v1577_v56 = vadd.f32 %v1221_v32, %v1219_v7 }
 0x330   : > { %1224 = vpow2.f32 %v724_v8 }
 0x332   : > { %v638_v57 = vpop.xlane.xlu1 %637 }
 0x333   : > { %v674_v37 = vsub.f32 %v1505_v13, %v638_v57  ;;  %v675_v59 = vsub.f32 %v1507_v14, %v638_v57 }
 0x335   : > { %v1223_v36 = vpop.eup %1222  ;;  %v726_v11 = vmul.f32 1.442695, %v674_v37  ;;  %v728_v40 = vmul.f32 1.442695, %v675_v59 }
 0x336   : > { %v1225_v38 = vpop.eup %1224  ;;  %v806_v39 = vpack.c.bf16 %v1223_v36, %v1219_v7 }
 0x337   : > { %v807_v60 = vpack.c.bf16 %v1225_v38, %v1221_v32  ;;  %v1581_v10 = vadd.f32 %v1225_v38, %v1223_v36  ;;  %1226 = vpow2.f32 %v726_v11 }
 0x338   : > { %849 = vmatmul.bf16.gmra.mxu3 %v806_v39  ;;  %1228 = vpow2.f32 %v728_v40 }
 0x339   : > { %898 = vmatmul.bf16.gmra.mxu0 %v807_v60 }
 0x33a   : > { %v641_v42 = vpop.xlane.xlu2 %640 }
 0x33b   : > { %v676_v43 = vsub.f32 %v1511_v16, %v641_v42  ;;  %v677_v44 = vsub.f32 %v1513_v17, %v641_v42 }
 0x33d   : > { %v730_v45 = vmul.f32 1.442695, %v676_v43  ;;  %v732_v47 = vmul.f32 1.442695, %v677_v44  ;;  %v1227_v14 = vpop.eup %1226 }
 0x33e   : > { %v1229_v48 = vpop.eup %1228 }
 0x33f   : > { %1230 = vpow2.f32 %v730_v45 }
 0x340   : > { %1232 = vpow2.f32 %v732_v47 }
 0x342   : > { %v644_v13 = vpop.xlane.xlu0 %643 }
 0x343   : > { %v678_v62 = vsub.f32 %v1517_v19, %v644_v13  ;;  %v679_v55 = vsub.f32 %v1519_v20, %v644_v13 }
 0x345   : > { %v1231_v49 = vpop.eup %1230  ;;  %v734_v16 = vmul.f32 1.442695, %v678_v62  ;;  %v736_v17 = vmul.f32 1.442695, %v679_v55 }
 0x346   : > { %v1233_v63 = vpop.eup %1232  ;;  %v808_v58 = vpack.c.bf16 %v1231_v49, %v1227_v14 }
 0x347   : > { %v809_v61 = vpack.c.bf16 %v1233_v63, %v1229_v48  ;;  %1234 = vpow2.f32 %v734_v16  ;;  %v783_v39 = vadd.f32 %v1233_v63, %v1231_v49 }
 0x348   : > { %854 = vmatmul.bf16.gmra.mxu3 %v808_v58  ;;  %1236 = vpow2.f32 %v736_v17 }
 0x349   : > { %903 = vmatmul.bf16.gmra.mxu0 %v809_v61 }
 0x34a   : > { %v647_v1 = vpop.xlane.xlu1 %646 }
 0x34b   : > { %v680_v50 = vsub.f32 %v1523_v23, %v647_v1  ;;  %v681_v2 = vsub.f32 %v1525_v26, %v647_v1 }
 0x34d   : > { %v738_v51 = vmul.f32 1.442695, %v680_v50  ;;  %v740_v6 = vmul.f32 1.442695, %v681_v2  ;;  %v1235_v9 = vpop.eup %1234 }
 0x34e   : > { %v1237_v12 = vpop.eup %1236 }
 0x34f   : > { %1238 = vpow2.f32 %v738_v51  ;;  %v786_v38 = vadd.f32 %v1237_v12, %v1235_v9 }
 0x350   : > { %1240 = vpow2.f32 %v740_v6 }
 0x352   : > { %v650_v19 = vpop.xlane.xlu2 %649 }
 0x353   : > { %v682_v20 = vsub.f32 %v1529_v28, %v650_v19  ;;  %v683_v53 = vsub.f32 %v1531_v29, %v650_v19 }
 0x355   : > { %v1239_v54 = vpop.eup %1238  ;;  %v742_v15 = vmul.f32 1.442695, %v682_v20  ;;  %v744_v22 = vmul.f32 1.442695, %v683_v53 }
 0x356   : > { %v1241_v4 = vpop.eup %1240  ;;  %v810_v23 = vpack.c.bf16 %v1239_v54, %v1235_v9 }
 0x357   : > { %1242 = vpow2.f32 %v742_v15  ;;  %v811_v26 = vpack.c.bf16 %v1241_v4, %v1237_v12 }
 0x358   : > { %1244 = vpow2.f32 %v744_v22  ;;  %859 = vmatmul.bf16.gmra.mxu3 %v810_v23 }
 0x359   : > { %908 = vmatmul.bf16.gmra.mxu0 %v811_v26 }
 0x35a   : > { %v653_v5 = vpop.xlane.xlu1 %652 }
 0x35b   : > { %v684_v25 = vsub.f32 %v1537_v34, %v653_v5  ;;  %v685_v27 = vsub.f32 %v1539_v35, %v653_v5  ;;  %v789_v34 = vadd.f32 %v1241_v4, %v1239_v54  ;;  %v780_v35 = vadd.f32 %v1229_v48, %v1227_v14 }
 0x35d   : > { %v1243_v30 = vpop.eup %1242  ;;  %v746_v28 = vmul.f32 1.442695, %v684_v25  ;;  %v748_v7 = vmul.f32 1.442695, %v685_v27 }
 0x35e   : > { %v1245_v29 = vpop.eup %1244 }
 0x35f   : > { %1246 = vpow2.f32 %v746_v28  ;;  %v792_v31 = vadd.f32 %v1245_v29, %v1243_v30 }
 0x360   : > { %1248 = vpow2.f32 %v748_v7 }
 0x361   : > { %793 = vadd.xlane.f32.xlu2 %v792_v31 }
 0x365   : > { %v1247_v8 = vpop.eup %1246 }
 0x366   : > { %v1249_v32 = vpop.eup %1248  ;;  %v812_v57 = vpack.c.bf16 %v1247_v8, %v1243_v30 }
 0x367   : > { %v795_v36 = vadd.f32 %v1249_v32, %v1247_v8  ;;  %v813_v37 = vpack.c.bf16 %v1249_v32, %v1245_v29 }
 0x368   : > { %864 = vmatmul.bf16.gmra.mxu3 %v812_v57 }
 0x369   : > { %796 = vadd.xlane.f32.xlu1 %v795_v36  ;;  %913 = vmatmul.bf16.gmra.mxu0 %v813_v37 }
 0x36a   : > { %787 = vadd.xlane.f32.xlu2 %v786_v38 }
 0x371   : > { %790 = vadd.xlane.f32.xlu1 %v789_v34 }
 0x372   : > { %781 = vadd.xlane.f32.xlu2 %v780_v35 }
 0x376   : > { %v879_v59 = vpop.f32.mrf.mxu0 }
 0x379   : > { %784 = vadd.xlane.f32.xlu1 %v783_v39 }
 0x37a   : > { %775 = vadd.xlane.f32.xlu2 %v1577_v56 }
 0x37b   : > { %v830_v60 = vpop.f32.mrf.mxu3 }
 0x37c   : > { %v1594_v11 = vadd.f32 %v879_v59, %v830_v60 }
 0x37e   : > { %v881_v40 = vpop.f32.mrf.mxu0 }
 0x381   : > { %778 = vadd.xlane.f32.xlu1 %v1581_v10 }
 0x382   : > { %769 = vadd.xlane.f32.xlu2 %v1569_v3 }
 0x383   : > { %v832_v42 = vpop.f32.mrf.mxu3 }
 0x384   : > { %v1598_v43 = vadd.f32 %v881_v40, %v832_v42 }
 0x386   : > { %v884_v44 = vpop.f32.mrf.mxu0 }
 0x389   : > { %772 = vadd.xlane.f32.xlu1 %v1573_v24 }
 0x38a   : > { %763 = vadd.xlane.f32.xlu2 %v1561_v41 }
 0x38b   : > { %v835_v45 = vpop.f32.mrf.mxu3 }
 0x38c   : > { %v1602_v47 = vadd.f32 %v884_v44, %v835_v45 }
 0x38e   : > { %v886_v56 = vpop.f32.mrf.mxu0 }
 0x391   : > { %766 = vadd.xlane.f32.xlu1 %v1565_v52 }
 0x392   : > { %757 = vadd.xlane.f32.xlu2 %v1553_v18 }
 0x393   : > { %v837_v13 = vpop.f32.mrf.mxu3 }
 0x394   : > { %v1606_v10 = vadd.f32 %v886_v56, %v837_v13 }
 0x396   : > { %v889_v3 = vpop.f32.mrf.mxu0 }
 0x399   : > { %760 = vadd.xlane.f32.xlu1 %v1557_v33 }
 0x39a   : > { %751 = vadd.xlane.f32.xlu2 %v1545_v46 }
 0x39b   : > { %v840_v14 = vpop.f32.mrf.mxu3 }
 0x39c   : > { %v1610_v24 = vadd.f32 %v889_v3, %v840_v14 }
 0x39e   : > { %v891_v41 = vpop.f32.mrf.mxu0 }
 0x3a1   : > { %754 = vadd.xlane.f32.xlu1 %v1549_v0 }
 0x3a3   : > { %v842_v48 = vpop.f32.mrf.mxu3 }
 0x3a4   : > { %v1613_v49 = vadd.f32 %v891_v41, %v842_v48 }
 0x3a6   : > { %v894_v52 = vpop.f32.mrf.mxu0 }
 0x3ab   : > { %v845_v62 = vpop.f32.mrf.mxu3 }
 0x3ac   : > { %v1615_v18 = vadd.f32 %v894_v52, %v845_v62 }
 0x3ae   : > { %v896_v63 = vpop.f32.mrf.mxu0 }
 0x3b3   : > { %v847_v55 = vpop.f32.mrf.mxu3 }
 0x3b4   : > { %v1617_v58 = vadd.f32 %v896_v63, %v847_v55 }
 0x3b6   : > { %v899_v33 = vpop.f32.mrf.mxu0 }
 0x3bb   : > { %v850_v61 = vpop.f32.mrf.mxu3 }
 0x3bc   : > { %v900_v46 = vadd.f32 %v899_v33, %v850_v61 }
 0x3be   : > { %v901_v16 = vpop.f32.mrf.mxu0 }
 0x3c3   : > { %v852_v17 = vpop.f32.mrf.mxu3 }
 0x3c4   : > { %v902_v1 = vadd.f32 %v901_v16, %v852_v17 }
 0x3c6   : > { %v904_v50 = vpop.f32.mrf.mxu0 }
 0x3cb   : > { %v855_v2 = vpop.f32.mrf.mxu3 }
 0x3cc   : > { %v905_v63 = vadd.f32 %v904_v50, %v855_v2 }
 0x3ce   : > { %v906_v0 = vpop.f32.mrf.mxu0 }
 0x3d3   : > { %v857_v51 = vpop.f32.mrf.mxu3 }
 0x3d4   : > { %v794_v6 = vpop.xlane.xlu2 %793  ;;  %v907_v52 = vadd.f32 %v906_v0, %v857_v51 }
 0x3d5   : > { %1250 = vrcp.f32 %v794_v6 }
 0x3d6   : > { %v909_v19 = vpop.f32.mrf.mxu0 }
 0x3db   : > { %v860_v9 = vpop.f32.mrf.mxu3  ;;  %v1251_v28 = vpop.eup %1250 }
 0x3dc   : > { %v797_v20 = vpop.xlane.xlu1 %796  ;;  %v910_v59 = vadd.f32 %v909_v19, %v860_v9 }
 0x3dd   : > { %v788_v53 = vpop.xlane.xlu2 %787  ;;  %1252 = vrcp.f32 %v797_v20 }
 0x3de   : > { %v911_v12 = vpop.f32.mrf.mxu0 }
 0x3e3   : > { %v862_v54 = vpop.f32.mrf.mxu3  ;;  %v1253_v31 = vpop.eup %1252 }
 0x3e4   : > { %v791_v15 = vpop.xlane.xlu1 %790  ;;  %v912_v38 = vadd.f32 %v911_v12, %v862_v54 }
 0x3e5   : > { %v782_v22 = vpop.xlane.xlu2 %781  ;;  %1254 = vrcp.f32 %v791_v15 }
 0x3e6   : > { %v914_v4 = vpop.f32.mrf.mxu0  ;;  %1256 = vrcp.f32 %v788_v53 }
 0x3eb   : > { %v865_v23 = vpop.f32.mrf.mxu3  ;;  %v1255_v36 = vpop.eup %1254 }
 0x3ec   : > { %v785_v26 = vpop.xlane.xlu1 %784  ;;  %v915_v25 = vadd.f32 %v914_v4, %v865_v23  ;;  %v1257_v37 = vpop.eup %1256  ;;  %v948_v39 = vmul.f32 %v1255_v36, %v912_v38 }
 0x3ed   : > { %v776_v5 = vpop.xlane.xlu2 %775  ;;  %v947_v44 = vmul.f32 %v1257_v37, %v910_v59 }
 0x3ee   : > { %1258 = vrcp.f32 %v776_v5  ;;  %v916_v27 = vpop.f32.mrf.mxu0  ;;  %v949_v32 = vmul.f32 %v1251_v28, %v915_v25 }
 0x3ef   : > { %v958_v3 = vpack.c.bf16 %v948_v39, %v947_v44 }
 0x3f1   : > { %v988_v55 = vsel %vm478_vm6, %v958_v3, 0 }
 0x3f3   : > { %v867_v30 = vpop.f32.mrf.mxu3 }
 0x3f4   : > { %v779_v7 = vpop.xlane.xlu1 %778  ;;  %v917_v29 = vadd.f32 %v916_v27, %v867_v30  ;;  %v1259_v35 = vpop.eup %1258 }
 0x3f5   : > { %1260 = vrcp.f32 %v779_v7  ;;  %v770_v8 = vpop.xlane.xlu2 %769  ;;  %v943_v45 = vmul.f32 %v1259_v35, %v900_v46 }
 0x3f6   : > { %v950_v57 = vmul.f32 %v1253_v31, %v917_v29  ;;  %1262 = vrcp.f32 %v785_v26  ;;  %v951_v29 = vld [vmem:[%s1665_s6] sm:$0x3] }
 0x3f7   : > { %1264 = vrcp.f32 %v782_v22 }
 0x3f8   : > { %v959_v34 = vpack.c.bf16 %v950_v57, %v949_v32  ;;  %1266 = vrcp.f32 %v770_v8 }
 0x3fa   : > { %v991_v60 = vsel %vm478_vm6, %v959_v34, 0 }
 0x3fb   : > { %v1261_v40 = vpop.eup %1260  ;;  %993 = vmatpush.bf16.xpose.msrb.mxu1 %v991_v60 }
 0x3fc   : > { %v773_v42 = vpop.xlane.xlu1 %772  ;;  %v944_v56 = vmul.f32 %v1261_v40, %v902_v1  ;;  %v1263_v41 = vpop.eup %1262 }
 0x3fd   : > { %1268 = vrcp.f32 %v773_v42  ;;  %v764_v13 = vpop.xlane.xlu2 %763  ;;  %v1265_v48 = vpop.eup %1264  ;;  %v946_v33 = vmul.f32 %v1263_v41, %v907_v52 }
 0x3fe   : > { %v956_v14 = vpack.c.bf16 %v944_v56, %v943_v45  ;;  %v1267_v62 = vpop.eup %1266  ;;  %1270 = vrcp.f32 %v764_v13  ;;  %v945_v17 = vmul.f32 %v1265_v48, %v905_v63 }
 0x3ff   : > { %v941_v46 = vmul.f32 %v1267_v62, %v1615_v18 }
 0x400   : > { %v957_v19 = vpack.c.bf16 %v946_v33, %v945_v17 }
 0x402   : > { %v985_v0 = vsel %vm478_vm6, %v957_v19, 0 }
 0x403   : > { %v1269_v61 = vpop.eup %1268  ;;  %994 = vmatpush.bf16.xpose.msrb.mxu1 %v988_v55 }
 0x404   : > { %v767_v16 = vpop.xlane.xlu1 %766  ;;  %v942_v1 = vmul.f32 %v1269_v61, %v1617_v58  ;;  %v1271_v20 = vpop.eup %1270  ;;  %v982_v58 = vsel %vm478_vm6, %v956_v14, 0 }
 0x405   : > { %1272 = vrcp.f32 %v767_v16  ;;  %v758_v6 = vpop.xlane.xlu2 %757  ;;  %v939_v51 = vmul.f32 %v1271_v20, %v1610_v24 }
 0x406   : > { %v955_v9 = vpack.c.bf16 %v942_v1, %v941_v46  ;;  %1274 = vrcp.f32 %v758_v6 }
 0x408   : > { %v979_v24 = vsel %vm478_vm6, %v955_v9, 0 }
 0x40b   : > { %v1273_v50 = vpop.eup %1272  ;;  %995 = vmatpush.bf16.xpose.msrb.mxu1 %v985_v0 }
 0x40c   : > { %v761_v2 = vpop.xlane.xlu1 %760  ;;  %v940_v53 = vmul.f32 %v1273_v50, %v1613_v49  ;;  %v1275_v54 = vpop.eup %1274  ;;  %v960_v49 = vld [vmem:[%s1666_s7] sm:$0xf] }
 0x40d   : > { %1276 = vrcp.f32 %v761_v2  ;;  %v752_v18 = vpop.xlane.xlu2 %751  ;;  %v937_v4 = vmul.f32 %v1275_v54, %v1602_v47  ;;  %963 = vperm.xlu2 %1185, %v960_v49  }
 0x40e   : > { %v954_v12 = vpack.c.bf16 %v940_v53, %v939_v51  ;;  %1278 = vrcp.f32 %v752_v18 }
 0x413   : > { %v1277_v15 = vpop.eup %1276  ;;  %996 = vmatpush.bf16.xpose.msrb.mxu1 %v982_v58 }
 0x414   : > { %v755_v22 = vpop.xlane.xlu1 %754  ;;  %v938_v23 = vmul.f32 %v1277_v15, %v1606_v10  ;;  %v1279_v5 = vpop.eup %1278  ;;  %v976_v10 = vsel %vm478_vm6, %v954_v12, 0 }
 0x415   : > { %1280 = vrcp.f32 %v755_v22  ;;  %v935_v27 = vmul.f32 %v1279_v5, %v1594_v11 }
 0x416   : > { %v953_v26 = vpack.c.bf16 %v938_v23, %v937_v4 }
 0x418   : > { %v973_v28 = vsel %vm478_vm6, %v953_v26, 0 }
 0x41b   : > { %v1281_v25 = vpop.eup %1280  ;;  %997 = vmatpush.bf16.xpose.msrb.mxu1 %v979_v24 }
 0x41c   : > { %v936_v30 = vmul.f32 %v1281_v25, %v1598_v43 }
 0x41e   : > { %v952_v47 = vpack.c.bf16 %v936_v30, %v935_v27 }
 0x420   : > { %v970_v7 = vsel %vm478_vm6, %v952_v47, 0 }
 0x423   : > { %998 = vmatpush.bf16.xpose.msrb.mxu1 %v976_v10 }
 0x42b   : > { %999 = vmatpush.bf16.xpose.msrb.mxu1 %v973_v28 }
 0x433   : > { %1000 = vmatpush.bf16.xpose.msrb.mxu1 %v970_v7 }
 0x43a   : > { %1137 = vmatmul.msk.bf16.vlgmr.msrb.gmra.mxu1 %vm478_vm6, %v951_v29 }
 0x467   : > { %v964_v31 = vpop.permute.xlu2 %963 }
 0x4b7   : > { %v1002_v11 = vpop.f32.mrf.mxu1 }
 0x4b8   : > { %v1003_v8 = vadd.f32 %v1002_v11, %v964_v31 }
 0x4ba   : > { %v1006_v43 = vadd.f32 %v1003_v8, %v1419_v21 }
 0x4bc   : > { %1007 = vst [vmem:[%s1410_s25] sm:$0xf] %v1006_v43 }
 0x4bf   : > { %v1004_v32 = vpop.f32.mrf.mxu1 }
 0x4c0 PF: > { %s18_s9 = sadd.s32 1, %s1320_s9   ;;  %s1668_s27 = smov %s1312_s29 }
 0x4c1   : > { %p15_p8 = scmp.ge.s32.totalorder %s18_s9, 6   ;;  %s1669_s28 = smov %s1316_s30 }
 0x4c2   : > { %s1670_s29 = smov %s1673_s10  ;;  %s1671_s30 = smov %s1677_s11 }
 0x4c3   :  { %17 = sbr.rel (!%p15_p8) target bundleno = 3 (0x3), region = 90 }

</bundles_post_ra>
